<compile_context>
chip_gen: v7x
topology: tpu7x:2x2x1
jax: 0.10.0
libtpu: 0.0.40
codegen_flags: <defaults>
</compile_context>

<pallas_src>
import jax
import jax.numpy as jnp
from jax.experimental import pallas as pl
from jax.experimental.pallas import tpu as pltpu


def _residual_pointwise_kernel(x_ref, w_ref, b_ref, o_ref):
    # x_ref: (1, C, TL)  NCL block (one batch element, one length tile)
    # w_ref: (C, C)      Conv1d weight (out_channels, in_channels), grid-resident
    # b_ref: (C, 1)      Conv1d bias, grid-resident, broadcasts over lanes (L)
    x = x_ref[0]                                               # (C, TL)
    # fn(x): 1x1 conv == per-position linear: y[o, l] = sum_c W[o, c] * x[c, l]
    y = jnp.dot(w_ref[...], x, preferred_element_type=jnp.float32)
    y = y + b_ref[...]                                         # (C, TL) + (C, 1)
    # Residual: fn(x) + x
    o_ref[0] = (y + x.astype(jnp.float32)).astype(o_ref.dtype)


def _pick_length_tile(L: int) -> int:
    # Prefer lane-dense tiles (multiple of 128) that evenly divide L; fall back
    # to the full extent for small / awkward L (full-extent blocks are always
    # legal w.r.t. the (8, 128) rule).
    for tl in (1024, 512, 256, 128):
        if L % tl == 0:
            return tl
    return L


def residual_pointwise(x_ncl, weight, bias):
    """out = Conv1d_1x1(x) + x  (Residual(fn) with fn = nn.Conv1d(C, C, 1)).

    x_ncl:  (B, C, L)  float32  (PyTorch NCL layout, used directly)
    weight: (C, C)     float32  (out_channels, in_channels)
    bias:   (C,)       float32
    returns (B, C, L)  float32
    """
    B, C, L = x_ncl.shape
    TL = _pick_length_tile(L)
    num_l_tiles = L // TL
    b2d = bias.reshape(C, 1)

    cost = pl.CostEstimate(
        flops=2 * B * L * C * C + 2 * B * L * C,
        transcendentals=0,
        bytes_accessed=2 * B * C * L * x_ncl.dtype.itemsize
        + weight.size * weight.dtype.itemsize
        + bias.size * bias.dtype.itemsize,
    )

    return pl.pallas_call(
        _residual_pointwise_kernel,
        out_shape=jax.ShapeDtypeStruct((B, C, L), x_ncl.dtype),
        grid_spec=pltpu.PrefetchScalarGridSpec(
            num_scalar_prefetch=0,
            grid=(B, num_l_tiles),
            in_specs=[
                pl.BlockSpec((1, C, TL), lambda b, l: (b, 0, l)),  # x tile
                pl.BlockSpec((C, C), lambda b, l: (0, 0)),         # weight (resident)
                pl.BlockSpec((C, 1), lambda b, l: (0, 0)),         # bias   (resident)
            ],
            out_specs=pl.BlockSpec((1, C, TL), lambda b, l: (b, 0, l)),
        ),
        compiler_params=pltpu.CompilerParams(
            dimension_semantics=("parallel", "parallel"),
        ),
        cost_estimate=cost,
    )(x_ncl, weight, b2d)


if __name__ == "__main__":
    key = jax.random.PRNGKey(0)
    kx, kw, kb = jax.random.split(key, 3)

    B, C, L = 2, 4, 16                                         # small NCL shapes
    x = jax.random.normal(kx, (B, C, L), dtype=jnp.float32)
    weight = jax.random.normal(kw, (C, C), dtype=jnp.float32) * 0.1
    bias = jax.random.normal(kb, (C,), dtype=jnp.float32) * 0.1

    out = residual_pointwise(x, weight, bias)
    out = jax.block_until_ready(out)

    # Pure-JAX reference of Residual(Conv1d(C, C, 1)):  fn(x) + x
    y_ref = jnp.einsum("oc,bcl->bol", weight, x) + bias[None, :, None]
    ref = y_ref + x

    assert out.shape == x.shape and out.dtype == x.dtype
    assert jnp.allclose(out, ref, atol=1e-5, rtol=1e-5), "mismatch vs reference"
    print("KERNEL_OK")
</pallas_src>

<mosaic_0001>
module attributes {stable_mosaic.version = 11 : i64} {
  func.func @_residual_pointwise_kernel(%arg0: i32, %arg1: i32, %arg2: memref<1x4x16xf32, #tpu.memory_space<vmem>>, %arg3: memref<4x4xf32, #tpu.memory_space<vmem>>, %arg4: memref<4x1xf32, #tpu.memory_space<vmem>>, %arg5: memref<1x4x16xf32, #tpu.memory_space<vmem>>) attributes {dimension_semantics = [#tpu.dimension_semantics<parallel>, #tpu.dimension_semantics<parallel>], iteration_bounds = array<i64: 2, 1>, scalar_prefetch = 0 : i64, scratch_operands = 0 : i64, tpu.core_type = #tpu.core_type<tc>, window_params = [{transform_indices = @transform_0, window_bounds = array<i64: 1, 4, 16>}, {pipeline_mode = #tpu.pipeline_mode<synchronous>, transform_indices = @transform_1, window_bounds = array<i64: 4, 4>}, {pipeline_mode = #tpu.pipeline_mode<synchronous>, transform_indices = @transform_2, window_bounds = array<i64: 4, 1>}, {transform_indices = @transform_3, window_bounds = array<i64: 1, 4, 16>}]} {
    %c0 = arith.constant 0 : index
    %c0_0 = arith.constant 0 : index
    %c0_1 = arith.constant 0 : index
    %0 = vector.load %arg2[%c0, %c0_0, %c0_1] : memref<1x4x16xf32, #tpu.memory_space<vmem>>, vector<1x4x16xf32>
    %1 = vector.shape_cast %0 : vector<1x4x16xf32> to vector<4x16xf32>
    %c0_2 = arith.constant 0 : index
    %c0_3 = arith.constant 0 : index
    %2 = vector.load %arg3[%c0_2, %c0_3] : memref<4x4xf32, #tpu.memory_space<vmem>>, vector<4x4xf32>
    %cst = arith.constant dense<0.000000e+00> : vector<4x16xf32>
    %3 = tpu.matmul %2, %1, %cst {dimension_numbers = #tpu.dot_dimension_numbers<[1], [0], [0], [1], [0, 0, 1, 1], [], []>} : vector<4x4xf32>, vector<4x16xf32>, vector<4x16xf32> -> vector<4x16xf32>
    %c0_4 = arith.constant 0 : index
    %c0_5 = arith.constant 0 : index
    %4 = vector.load %arg4[%c0_4, %c0_5] : memref<4x1xf32, #tpu.memory_space<vmem>>, vector<4x1xf32>
    %5 = vector.broadcast %4 : vector<4x1xf32> to vector<4x16xf32>
    %6 = arith.addf %3, %5 : vector<4x16xf32>
    %7 = arith.addf %6, %1 : vector<4x16xf32>
    %c0_6 = arith.constant 0 : index
    %c0_7 = arith.constant 0 : index
    %c0_8 = arith.constant 0 : index
    %8 = vector.load %arg5[%c0_6, %c0_7, %c0_8] : memref<1x4x16xf32, #tpu.memory_space<vmem>>, vector<1x4x16xf32>
    %9 = vector.shape_cast %8 : vector<1x4x16xf32> to vector<4x16xf32>
    %10 = vector.shape_cast %7 : vector<4x16xf32> to vector<1x4x16xf32>
    tpu.vector_store %arg5[%c0_6, %c0_7, %c0_8], %10 {strides = array<i32>} : memref<1x4x16xf32, #tpu.memory_space<vmem>>, vector<1x4x16xf32>,
    return
  }
  func.func @transform_0(%arg0: i32, %arg1: i32) -> (i32, i32, i32) {
    %c0_i32 = arith.constant 0 : i32
    %c0_i32_0 = arith.constant 0 : i32
    return %arg0, %c0_i32, %arg1 : i32, i32, i32
  }
  func.func @transform_1(%arg0: i32, %arg1: i32) -> (i32, i32) {
    %c0_i32 = arith.constant 0 : i32
    %c0_i32_0 = arith.constant 0 : i32
    %c0_i32_1 = arith.constant 0 : i32
    return %c0_i32, %c0_i32_0 : i32, i32
  }
  func.func @transform_2(%arg0: i32, %arg1: i32) -> (i32, i32) {
    %c0_i32 = arith.constant 0 : i32
    %c0_i32_0 = arith.constant 0 : i32
    %c0_i32_1 = arith.constant 0 : i32
    return %c0_i32, %c0_i32_0 : i32, i32
  }
  func.func @transform_3(%arg0: i32, %arg1: i32) -> (i32, i32, i32) {
    %c0_i32 = arith.constant 0 : i32
    %c0_i32_0 = arith.constant 0 : i32
    return %arg0, %c0_i32, %arg1 : i32, i32, i32
  }
}

</mosaic_0001>

<bundles_post_ra>
// kernel: tpu_custom_call.1
= control target key start
LH: loop header
LB: loop body
LE: loop exit
PB: predicated region body
PF: predicated region fallthrough
CT: control target
= control target key end

     0   :  { %8 = vsyncpa [#allocation3], 0  ;;  %s792_s0 = inlined_call_operand.hbm [shape: f32[2,4,16], index: 0, kind: input, shape index: {}]   ;;  %s793_s1 = inlined_call_operand.vmem [shape: f32[4,4], index: 1, kind: input, shape index: {}]   ;;  %s794_s2 = inlined_call_operand.vmem [shape: f32[4,1], index: 2, kind: input, shape index: {}]   ;;  %s795_s3 = inlined_call_operand.hbm [shape: f32[2,4,16], index: 3, kind: output, shape index: {}]  }
   0x1   :  { %10 = vsyncpa [#allocation3 + $0x1], 0 }
   0x2   :  { %11 = vsyncpa [#allocation4], 0 }
   0x3   :  { %13 = vsyncpa [#allocation4 + $0x1], 0  ;;  %s614_s12 = smov 0   ;;  %s616_s13 = smov 0  }
   0x4   :  { %s618_s14 = smov 0   ;;  %s620_s15 = smov 0  }
   0x5   :  { %s622_s16 = smov 0   ;;  %s624_s17 = smov 0  }
   0x6 LB: > { %s387_s18 = sadd.s32 4294967295, %s587_s17   ;;  %s388_s19 = sadd.s32 4294967294, %s587_s17   ;;  %s587_s17 = sphi %s624_s17, %s19_s17   ;;  %s583_s16 = sphi %s622_s16, %s811_s16   ;;  %s579_s15 = sphi %s620_s15, %s810_s15   ;;  %s575_s14 = sphi %s618_s14, %s809_s14   ;;  %s571_s13 = sphi %s616_s13, %s808_s13   ;;  %s567_s12 = sphi %s614_s12, %s807_s12  }
   0x7   : > { %s31_s20 = sadd.s32 1, %s583_s16  ;;  %s40_s21 = sadd.s32 1, %s575_s14 }
   0x8   : > { %p33_p0 = scmp.ge.s32.totalorder %s31_s20, 2  ;;  %p47_p1 = scmp.ne.s32.totalorder %s575_s14, %s571_s13 }
   0x9   : > { %p48_p2 = scmp.eq.s32.totalorder %s587_s17, 0  ;;  %p53_p3 = scmp.ne.s32.totalorder %s571_s13, %s567_s12 }
   0xa   : > { %s813_s20 = smov (%p33_p0, %s31_s20), 0  ;;  %p54_p5 = scmp.eq.s32.totalorder %s387_s18, 0 }
   0xb   : > { %p655_p4 = por %p48_p2, %p47_p1  ;;  %s35_s23 = ssub.s32 %s583_s16, %s813_s20 }
   0xc   : > { %p121_p6 = scmp.eq.s32.totalorder %s387_s18, 1  ;;  %p38_p7 = scmp.eq.s32.totalorder %s35_s23, 0 }
   0xd   : > { %p661_p8 = por %p54_p5, %p53_p3  ;;  %p127_p10 = scmp.eq.s32.totalorder %s388_s19, 1 }
   0xe   : > { %p665_p9 = por %p121_p6, %p47_p1  ;;  %p421_p13 = scmp.lt.s32.totalorder %s587_s17, 2 }
   0xf   : > { %s670_s26 = scalar_select %p38_p7, %s575_s14, %s40_s21  }
  0x10   : > { %s799_s25 = scalar_select %p665_p9, 1, 0 }
  0x11   : > { %p672_p11 = por %p127_p10, %p53_p3  ;;  %s153_s28 = sand.u32 1, %s575_s14  }
  0x12   : > { %s391_s29 = sshll.u32 %s153_s28, 2  ;;  %s392_s30 = sshll.u32 %s583_s16, 6 }
  0x13   : > { %s800_s27 = scalar_select %p672_p11, 1, 0 }
  0x14   : > { %s683_s6 = scalar_lea.hbm %s792_s0, %s392_s30  ;;  %s157_s7 = scalar_lea.vmem [#allocation2], %s391_s29 }
  0x15   : > { %s165_s8 = sshll.u32 %s157_s7, 4  ;;  %p689_p0 = pnand %p421_p13, %p655_p4  ;;  %s685_s8 = int_to_ptr.vmem [resolvable:$true] %s165_s8 }
  0x16   : > { %s154_s10 = scalar_lea.sflag [#allocation3], %s153_s28  ;;  %s475_s11 = scalar_lea.hbm %s683_s6, 64 }
  0x17   : > { %p476_p3 = scmp.ne.s32.totalorder %s683_s6, %s475_s11  ;;  %p477_p5 = pneg %p689_p0 }
  0x18   : > { %s480_s21 = scalar_lea.hbm %s792_s0, 128  ;;  %p481_p4 = scmp.lt.u32.totalorder %s683_s6, %s792_s0 }
  0x19   : > { %p478_p6 = pnand %p477_p5, %p476_p3  ;;  %p482_p10 = scmp.lt.u32.totalorder %s480_s21, %s475_s11 }
  0x1a   : > { %p484_p12 = scmp.lt.u32.totalorder %s475_s11, %s683_s6 }
  0x1b   : > { %p479_p7 = pneg %p478_p6  ;;  %p483_p13 = por %p482_p10, %p481_p4 }
  0x1d   : > { %p485_p1 = por %p484_p12, %p483_p13 }
  0x1f   : > { %p486_p2 = pnand %p485_p1, %p479_p7 }
  0x21   : > { %489 = shalt.err (!%p486_p2)
}
  0x22   : > { %s490_s28 = scalar_lea.vmem %s685_s8, 64  ;;  %s589_s29 = smov [#allocation2]  }
  0x23   : > { %p491_p3 = scmp.ne.s32.totalorder %s685_s8, %s490_s28  ;;  %s495_s30 = sshll.u32 %s589_s29, 4  ;;  %s496_s30 = int_to_ptr.vmem [resolvable:$false] %s495_s30 }
  0x24   : > { %s497_s4 = scalar_lea.vmem %s496_s30, 128  ;;  %p498_p9 = scmp.lt.s32.totalorder %s685_s8, %s496_s30 }
  0x25   : > { %p493_p6 = pnand %p491_p3, %p477_p5  ;;  %p499_p4 = scmp.lt.s32.totalorder %s497_s4, %s490_s28 }
  0x27   : > { %p494_p11 = pneg %p493_p6  ;;  %p500_p10 = por %p499_p4, %p498_p9 }
  0x29   : > { %p501_p12 = pnand %p500_p10, %p494_p11 }
  0x2b   : > { %504 = shalt.err (!%p501_p12)
}
  0x2c   : > { %416 = dma.hbm_to_vmem [thread:$0]  (!%p689_p0), %s683_s6, 64, %s685_s8, %s154_s10  }
  0x2d   : > { %p802_p1 = scmp.lt.s32.totalorder %s587_s17, 3  ;;  %p803_p2 = scmp.ge.s32.totalorder %s587_s17, 1 }
  0x2f   : > { %p171_p5 = pnand %p803_p2, %p802_p1 }
  0x30   : > { %s725_s5 = sand.u32 (!%p171_p5), 1, %s571_s13  }
  0x31   : > { %174 = sbr.rel (%p171_p5) target bundleno = 290 (0x122), region = 32  ;;  %s394_s7 = sshll.u32 (!%p171_p5), %s725_s5, 2 }
  0x32   : > { %s177_s11 = scalar_lea.sflag (!%p171_p5), [#allocation3], %s725_s5  ;;  %s180_s18 = scalar_lea.vmem (!%p171_p5), [#allocation2], %s394_s7 }
  0x38   : > { %558 = dma.done.wait (%p661_p8), %s177_s11, 64  }
  0x39   : > { %560 = vsyncadd (%p661_p8), %s177_s11, 4294967232  ;;  %v590_v0 = vmov 0.0   ;;  %vm591_vm0 = vmmov 0   ;;  %v592_v1 = vmov 0   ;;  %vm215_vm1 = vcmask 1043456   ;;  %s399_s24 = sshll.u32 %s579_s15, 6 }
  0x3a   : > { %404 = vmatprep.subr.mxu0 %v590_v0  ;;  %406 = vmatprep.mubr.msk.f32.mxu0 %vm591_vm0, %v590_v0  ;;  %vm211_vm2 = vcmask 31744   ;;  %v203_v2 = vld [vmem:[%s180_s18] sm:$0xf]  ;;  %s202_s19 = scalar_lea.vmem [#allocation5], %s394_s7  ;;  %vm290_vm3 = vcmask 125952   ;;  %s743_s28 = scalar_lea.hbm %s795_s3, %s399_s24 }
  0x3b   : > { %474 = vset.pattern.permute.xlu0 %v592_v1  ;;  %v204_v3 = vld [vmem:[%s793_s1] sm:$0xf]  ;;  %405 = vmatpush3.msk.msra.mxu0 %vm215_vm1, %v203_v2  ;;  %s307_s21 = sshll.u32 %s202_s19, 4  ;;  %s293_s29 = scalar_lea.sflag [#allocation4], %s725_s5  ;;  %s745_s21 = int_to_ptr.vmem [resolvable:$true] %s307_s21 }
  0x3c   : > { %v205_v4 = vld [vmem:[%s794_s2] sm:$0xf]  ;;  %407 = vmatmul.mubr.msk.f32.vlgmr.msra.gmra.mrb[0].mxu0 %vm211_vm2, %v204_v3  ;;  %s505_s30 = scalar_lea.vmem %s745_s21, 64  ;;  %p804_p9 = scmp.ne.s32.totalorder %s799_s25, 0 }
  0x3d   : > { %208 = vperm.xlu0 %474, %v205_v4   ;;  %p506_p8 = scmp.ne.s32.totalorder %s745_s21, %s505_s30  ;;  %s593_s15 = smov [#allocation5]  }
  0x3e   : > { %s509_s4 = sshll.u32 %s593_s15, 4  ;;  %s510_s4 = int_to_ptr.vmem [resolvable:$false] %s509_s4 }
  0x3f   : > { %p507_p11 = pnand %p506_p8, %p804_p9  ;;  %s511_s7 = scalar_lea.vmem %s510_s4, 128 }
  0x40   : > { %p512_p7 = scmp.lt.s32.totalorder %s745_s21, %s510_s4  ;;  %p513_p13 = scmp.lt.s32.totalorder %s511_s7, %s505_s30 }
  0x41   : > { %p508_p0 = pneg %p507_p11 }
  0x42   : > { %p514_p3 = por %p513_p13, %p512_p7 }
  0x44   : > { %p515_p6 = pnand %p514_p3, %p508_p0 }
  0xbc   : > { %v209_v5 = vpop.permute.xlu0 %208 }
 0x10f   : > { %v285_v6 = vpop.f32.mrb[0].mxu0 }
 0x110   : > { %v286_v7 = vadd.f32 %v285_v6, %v209_v5  ;;  %v408_v8 = vpop.f32.mrb[1].mxu0 }
 0x112   : > { %v289_v9 = vadd.f32 %v286_v7, %v203_v2 }
 0x114   : > { %291 = vst.msk [vmem:[%s202_s19] sm:$0xf] %vm290_vm3, %v289_v9 }
 0x115   : > { %518 = shalt.err (!%p515_p6)
}
 0x116   : > { %s519_s5 = scalar_lea.hbm %s743_s28, 64  ;;  %s523_s6 = scalar_lea.hbm %s795_s3, 128 }
 0x117   : > { %p520_p4 = scmp.ne.s32.totalorder %s743_s28, %s519_s5  ;;  %p524_p1 = scmp.lt.u32.totalorder %s743_s28, %s795_s3 }
 0x118   : > { %p525_p2 = scmp.lt.u32.totalorder %s523_s6, %s519_s5  ;;  %p527_p8 = scmp.lt.u32.totalorder %s519_s5, %s743_s28 }
 0x119   : > { %p521_p10 = pnand %p520_p4, %p804_p9 }
 0x11a   : > { %p526_p5 = por %p525_p2, %p524_p1 }
 0x11b   : > { %p522_p12 = pneg %p521_p10 }
 0x11c   : > { %p528_p11 = por %p527_p8, %p526_p5 }
 0x11e   : > { %p529_p0 = pnand %p528_p11, %p522_p12 }
 0x120   : > { %532 = shalt.err (!%p529_p0)
}
 0x121   : > { %411 = dma.vmem_to_hbm [thread:$0]  (%p804_p9), %s745_s21, 64, %s743_s28, %s293_s29  }
 0x122 PF: > { %s319_s10 = sand.u32 1, %s567_s12   ;;  %p805_p7 = scmp.ne.s32.totalorder %s800_s27, 0 }
 0x123   : > { %p806_p13 = scmp.ge.s32.totalorder %s587_s17, 2  ;;  %s320_s24 = scalar_lea.sflag [#allocation4], %s319_s10 }
 0x125   : > { %p418_p3 = pnand %p806_p13, %p805_p7 }
 0x127   : > { %562 = dma.done.wait (!%p418_p3), %s320_s24, 64  }
 0x128   : > { %564 = vsyncadd (!%p418_p3), %s320_s24, 4294967232  ;;  %s19_s17 = sadd.s32 1, %s587_s17   ;;  %s807_s12 = smov %s571_s13 }
 0x129   : > { %p16_p6 = scmp.ge.s32.totalorder %s19_s17, 4   ;;  %s808_s13 = smov %s575_s14 }
 0x12a   : > { %s809_s14 = smov %s670_s26  ;;  %s810_s15 = smov %s583_s16 }
 0x12b   : > { %s811_s16 = smov %s813_s20  ;;  %18 = sbr.rel (!%p16_p6) target bundleno = 6 (0x6), region = 77 }
 0x132   :  { %325 = vsyncpa [#allocation3], 1 }
 0x133   :  { %327 = vsyncpa [#allocation3 + $0x1], 1 }
 0x134   :  { %328 = vsyncpa [#allocation4], 1 }
 0x135   :  { %330 = vsyncpa [#allocation4 + $0x1], 1 }

</bundles_post_ra>
